<compile_context>
chip_gen: v6e
topology: v6e:2x2x1
jax: 0.10.0
libtpu: 0.0.40
codegen_flags: <defaults>
</compile_context>

<pallas_src>
import functools
from typing import NamedTuple

import jax
import jax.numpy as jnp
from jax.experimental import pallas as pl
from jax.experimental.pallas import tpu as pltpu


# ---------------------------------------------------------------------------
# Kernel
# ---------------------------------------------------------------------------
def _auglag_kernel(x_ref, wp_ref, base_ref, b_ref, o_ref, *, act, n_bits):
    """One (O-block, I-block) grid step of  out = act(x @ w + b).

    x_ref    : (B_p, tile_I)             f32  VMEM
    wp_ref   : (n_bits, tile_I, tile_O)  bf16 VMEM  (bit planes, O on lanes)
    base_ref : (n_bits,)                 f32  SMEM  (= base * step_size [* 2 if ocm])
    b_ref    : (1, tile_O)               f32  VMEM  (= bias [* 2 if ocm])
    o_ref    : (B_p, tile_O)             f32  VMEM  (doubles as the accumulator)
    """
    ki = pl.program_id(1)
    last = pl.num_programs(1) - 1

    @pl.when(ki == 0)
    def _():
        o_ref[...] = jnp.zeros_like(o_ref)

    x = x_ref[...]
    acc = o_ref[...]
    # Per-plane MXU accumulation: bf16 plane k gets one fused upcast+scale on
    # the VPU (which has slack -- the kernel is HBM-bound) and is fed straight
    # to the MXU; the n_bits reduction happens in the f32 accumulator.
    for k in range(n_bits):
        wk = wp_ref[k].astype(jnp.float32) * base_ref[k]
        acc = acc + jnp.dot(x, wk, preferred_element_type=jnp.float32)

    @pl.when(ki != last)
    def _():
        o_ref[...] = acc

    @pl.when(ki == last)
    def _():
        y = acc + b_ref[...]
        if act == "sigmoid2":
            o_ref[...] = jax.nn.sigmoid(y)   # the "2 *" is folded into base & bias
        elif act == "tanh":
            o_ref[...] = jnp.tanh(y)
        else:
            o_ref[...] = y


# ---------------------------------------------------------------------------
# Planning (device-aware tiles / VMEM limit) & host-side layout prep
# ---------------------------------------------------------------------------
class Plan(NamedTuple):
    B_p: int
    I_p: int
    O_p: int
    ti: int
    to: int
    n_bits: int
    vmem_limit: int


def _round_up(x, m):
    return (x + m - 1) // m * m


def _vmem_capacity_bytes():
    try:
        cap = getattr(pltpu.get_tpu_info(), "vmem_capacity_bytes", None)
        if cap:
            return int(cap)
    except Exception:
        pass
    return 64 << 20  # conservative default: v7x per-TensorCore VMEM


def _pick_tile(dim, pref, unit=128):
    """Lane/sublane-friendly tile minimizing padded extent (bandwidth matters)."""
    dim_u = _round_up(max(dim, 1), unit)
    if dim_u <= pref:
        return dim_u, dim_u
    best_t, best_pad = pref, _round_up(dim_u, pref)
    for t in range(pref, unit - 1, -unit):
        padded = _round_up(dim_u, t)
        if padded < best_pad:
            best_t, best_pad = t, padded
    return best_t, best_pad


def make_plan(batch, in_features, out_features, n_bits, tile_i=None, tile_o=None):
    cap = _vmem_capacity_bytes()
    big_vmem = cap >= (100 << 20)          # v5e/v6e: 128 MiB;  v7x: 64 MiB per TC
    if tile_i is None:
        tile_i = 1024 if big_vmem else 512
    if tile_o is None:
        tile_o = 512 if big_vmem else 256

    ti, I_p = _pick_tile(in_features, tile_i)
    to, O_p = _pick_tile(out_features, tile_o)

    # Guarantee >=2 blocks along the "parallel" O axis when possible (both
    # TensorCores get work on v7x / megacore chips) without adding padding.
    if O_p // to < 2 and O_p > 128:
        for t in range(((O_p // 2) // 128) * 128, 127, -128):
            if O_p % t == 0:
                to = t
                break

    B_p = _round_up(batch, 8)

    # Double-buffered per-block VMEM footprint (bit planes are bf16).
    blk = 2 * (n_bits * ti * to * 2 + B_p * ti * 4 + to * 4 + B_p * to * 4)
    vmem_limit = int(min(max(blk + (16 << 20), 32 << 20),
                         max(cap * 3 // 4, blk + (4 << 20))))

    return Plan(B_p=B_p, I_p=I_p, O_p=O_p, ti=ti, to=to,
                n_bits=n_bits, vmem_limit=vmem_limit)


def prepare_bit_planes(w_twos, plan):
    """(O, I, n_bits) float planes -> (n_bits, I_p, O_p) bf16 in kernel layout.

    Call once per weight update (attack step), NOT per forward: this is the only
    full-tensor copy and it is hoisted out of the forward hot path.  bf16 is
    exact for binary {0,1} planes; during the continuous relaxation it rounds
    to ~3 significant digits (acceptable for the attack objective).
    """
    # TODO(synk): on v5e/v6e, strictly-binary planes could be packed to uint8
    # (all n_bits per weight) for a further large HBM cut; v7x MXU has no int path.
    O, I, n_bits = w_twos.shape
    assert n_bits == plan.n_bits
    wp = jnp.transpose(w_twos.astype(jnp.bfloat16), (2, 1, 0))   # (n_bits, I, O)
    return jnp.pad(wp, ((0, 0), (0, plan.I_p - I), (0, plan.O_p - O)))


# ---------------------------------------------------------------------------
# Forward
# ---------------------------------------------------------------------------
@functools.partial(jax.jit, static_argnames=("plan", "ocm", "output_act"))
def auglag_forward(x, w_planes, base, b, step_size, *, plan, ocm=True,
                   output_act=None):
    """AugLag.forward with pre-prepared bit planes (see prepare_bit_planes)."""
    B, I = x.shape
    O = b.shape[-1]
    n_bits = plan.n_bits
    assert w_planes.shape == (n_bits, plan.I_p, plan.O_p)

    act = "sigmoid2" if ocm else ("tanh" if output_act == "tanh" else "none")
    act_scale = 2.0 if act == "sigmoid2" else 1.0

    # Constant folding (step_size stays traced -> no recompile when it changes).
    scale = jnp.asarray(step_size, jnp.float32) * act_scale
    base_f = base.reshape(-1).astype(jnp.float32) * scale
    b_f = b.astype(jnp.float32).reshape(1, O) * act_scale

    x_p = jnp.pad(x.astype(jnp.float32), ((0, plan.B_p - B), (0, plan.I_p - I)))
    b_p = jnp.pad(b_f, ((0, 0), (0, plan.O_p - O)))

    grid = (plan.O_p // plan.to, plan.I_p // plan.ti)   # reduction (I) axis last
    n_ob = grid[0]

    kernel = functools.partial(_auglag_kernel, act=act, n_bits=n_bits)

    flops = 2 * plan.B_p * plan.I_p * plan.O_p * n_bits + n_bits * plan.I_p * plan.O_p
    bytes_accessed = (2 * n_bits * plan.I_p * plan.O_p          # bf16 planes, read once
                      + 4 * plan.B_p * plan.I_p * n_ob          # x re-read per O block
                      + 4 * plan.B_p * plan.O_p + 4 * plan.O_p)
    cost = pl.CostEstimate(
        flops=flops,
        transcendentals=(plan.B_p * plan.O_p) if act != "none" else 0,
        bytes_accessed=bytes_accessed)

    out = pl.pallas_call(
        kernel,
        out_shape=jax.ShapeDtypeStruct((plan.B_p, plan.O_p), jnp.float32),
        grid=grid,
        in_specs=[
            pl.BlockSpec((plan.B_p, plan.ti), lambda i, k: (0, k)),            # x
            pl.BlockSpec((n_bits, plan.ti, plan.to), lambda i, k: (0, k, i)),  # bf16 planes
            pl.BlockSpec(memory_space=pltpu.SMEM),                             # folded base
            pl.BlockSpec((1, plan.to), lambda i, k: (0, i)),                   # folded bias
        ],
        out_specs=pl.BlockSpec((plan.B_p, plan.to), lambda i, k: (0, i)),
        compiler_params=pltpu.CompilerParams(
            dimension_semantics=("parallel", "arbitrary"),
            vmem_limit_bytes=plan.vmem_limit,
        ),
        cost_estimate=cost,
    )(x_p, w_planes, base_f, b_p)

    return out[:B, :O]


# ---------------------------------------------------------------------------
# Deterministic parameter construction + reference
# ---------------------------------------------------------------------------
def make_params(key, out_features, in_features, n_bits):
    """Build w_twos (two's-complement bit planes), base, bias (matches reset_w_twos)."""
    k_w, k_b = jax.random.split(key)
    w_int = jax.random.randint(
        k_w, (out_features, in_features), -(2 ** (n_bits - 1)), 2 ** (n_bits - 1),
        dtype=jnp.int32)
    w_uint = jnp.bitwise_and(w_int, (1 << n_bits) - 1)
    shifts = jnp.arange(n_bits - 1, -1, -1, dtype=jnp.int32)             # MSB..LSB
    w_twos = ((w_uint[..., None] >> shifts[None, None, :]) & 1).astype(jnp.float32)
    base_vals = 2.0 ** jnp.arange(n_bits - 1, -1, -1, dtype=jnp.float32)
    base_vals = base_vals.at[0].multiply(-1.0)
    base = base_vals.reshape(1, 1, n_bits)
    b = jax.random.normal(k_b, (out_features,), dtype=jnp.float32) * 0.1
    return w_twos, base, b, w_int


def _reference(x, w_twos, base, b, step_size, ocm=True, output_act=None):
    w_ref = jnp.sum(w_twos * base, axis=2) * step_size
    y = x @ w_ref.T + b
    if ocm:
        return jax.nn.sigmoid(2.0 * y)
    if output_act == "tanh":
        return jnp.tanh(y)
    return y


if __name__ == "__main__":
    key = jax.random.PRNGKey(0)
    k_x, k_p, k_x2, k_p2 = jax.random.split(key, 4)

    # --- small demo shapes (module-scale) ------------------------------------
    batch, in_features, out_features, n_bits = 8, 32, 16, 8
    step_size = 0.01

    x = jax.random.normal(k_x, (batch, in_features), dtype=jnp.float32)
    w_twos, base, b, w_int = make_params(k_p, out_features, in_features, n_bits)

    plan = make_plan(batch, in_features, out_features, n_bits)
    w_planes = prepare_bit_planes(w_twos, plan)     # once per weight update, reused below

    out = jax.block_until_ready(
        auglag_forward(x, w_planes, base, b, step_size, plan=plan, ocm=True))
    ref = _reference(x, w_twos, base, b, step_size, ocm=True)

    w_rec = jnp.sum(w_twos * base, axis=2) * step_size
    assert jnp.allclose(w_rec, w_int.astype(jnp.float32) * step_size, atol=1e-5)
    assert out.shape == (batch, out_features)
    assert jnp.allclose(out, ref, atol=1e-5, rtol=1e-5)

    # step_size stays a traced value: a different step reuses the same compilation
    out_b = jax.block_until_ready(
        auglag_forward(x, w_planes, base, b, 0.02, plan=plan, ocm=True))
    ref_b = _reference(x, w_twos, base, b, 0.02, ocm=True)
    assert jnp.allclose(out_b, ref_b, atol=1e-5, rtol=1e-5)

    # --- larger shapes exercising the multi-block grid + padding path --------
    B2, I2, O2 = 16, 1100, 300
    x2 = jax.random.normal(k_x2, (B2, I2), dtype=jnp.float32)
    w_twos2, base2, b2, _ = make_params(k_p2, O2, I2, n_bits)

    plan2 = make_plan(B2, I2, O2, n_bits)
    w_planes2 = prepare_bit_planes(w_twos2, plan2)

    out2 = jax.block_until_ready(
        auglag_forward(x2, w_planes2, base2, b2, step_size, plan=plan2, ocm=True))
    ref2 = _reference(x2, w_twos2, base2, b2, step_size, ocm=True)
    assert out2.shape == (B2, O2)
    assert jnp.allclose(out2, ref2, atol=1e-4, rtol=1e-4)

    print("KERNEL_OK")
</pallas_src>

<mosaic_0001>
module attributes {stable_mosaic.version = 11 : i64} {
  func.func @_auglag_kernel(%arg0: i32, %arg1: i32, %arg2: memref<8x128xf32, #tpu.memory_space<vmem>>, %arg3: memref<8x128x128xbf16, #tpu.memory_space<vmem>>, %arg4: memref<8xf32, #tpu.memory_space<smem>>, %arg5: memref<1x128xf32, #tpu.memory_space<vmem>>, %arg6: memref<8x128xf32, #tpu.memory_space<vmem>>) attributes {dimension_semantics = [#tpu.dimension_semantics<parallel>, #tpu.dimension_semantics<arbitrary>], iteration_bounds = array<i64: 1, 1>, scalar_prefetch = 0 : i64, scratch_operands = 0 : i64, tpu.core_type = #tpu.core_type<tc>, window_params = [{transform_indices = @transform_0, window_bounds = array<i64: 8, 128>}, {transform_indices = @transform_1, window_bounds = array<i64: 8, 128, 128>}, {transform_indices = @transform_2, window_bounds = array<i64: 8>}, {transform_indices = @transform_3, window_bounds = array<i64: 1, 128>}, {transform_indices = @transform_4, window_bounds = array<i64: 8, 128>}]} {
    %c0_i32 = arith.constant 0 : i32
    %0 = arith.cmpi eq, %arg1, %c0_i32 : i32
    %1 = arith.extui %0 : i1 to i32
    %c0_i32_0 = arith.constant 0 : i32
    %2 = arith.cmpi ne, %1, %c0_i32_0 : i32
    scf.if %2 {
      %cst_40 = arith.constant 0.000000e+00 : f32
      %75 = vector.broadcast %cst_40 : f32 to vector<8x128xf32>
      %c0_41 = arith.constant 0 : index
      %c0_42 = arith.constant 0 : index
      %76 = vector.load %arg6[%c0_41, %c0_42] : memref<8x128xf32, #tpu.memory_space<vmem>>, vector<8x128xf32>
      tpu.vector_store %arg6[%c0_41, %c0_42], %75 {strides = array<i32>} : memref<8x128xf32, #tpu.memory_space<vmem>>, vector<8x128xf32>,
    } else {
    }
    %c0 = arith.constant 0 : index
    %c0_1 = arith.constant 0 : index
    %3 = vector.load %arg2[%c0, %c0_1] : memref<8x128xf32, #tpu.memory_space<vmem>>, vector<8x128xf32>
    %c0_2 = arith.constant 0 : index
    %c0_3 = arith.constant 0 : index
    %4 = vector.load %arg6[%c0_2, %c0_3] : memref<8x128xf32, #tpu.memory_space<vmem>>, vector<8x128xf32>
    %c0_4 = arith.constant 0 : index
    %c0_5 = arith.constant 0 : index
    %c0_6 = arith.constant 0 : index
    %5 = vector.load %arg3[%c0_4, %c0_5, %c0_6] : memref<8x128x128xbf16, #tpu.memory_space<vmem>>, vector<1x128x128xbf16>
    %6 = vector.shape_cast %5 : vector<1x128x128xbf16> to vector<128x128xbf16>
    %7 = arith.extf %6 : vector<128x128xbf16> to vector<128x128xf32>
    %c0_7 = arith.constant 0 : index
    %8 = memref.load %arg4[%c0_7] : memref<8xf32, #tpu.memory_space<smem>>
    %9 = vector.broadcast %8 : f32 to vector<128x128xf32>
    %10 = arith.mulf %7, %9 : vector<128x128xf32>
    %cst = arith.constant dense<0.000000e+00> : vector<8x128xf32>
    %11 = tpu.matmul %3, %10, %cst {dimension_numbers = #tpu.dot_dimension_numbers<[1], [0], [0], [1], [0, 0, 1, 1], [], []>} : vector<8x128xf32>, vector<128x128xf32>, vector<8x128xf32> -> vector<8x128xf32>
    %12 = arith.addf %4, %11 : vector<8x128xf32>
    %c1 = arith.constant 1 : index
    %c0_8 = arith.constant 0 : index
    %c0_9 = arith.constant 0 : index
    %13 = vector.load %arg3[%c1, %c0_8, %c0_9] : memref<8x128x128xbf16, #tpu.memory_space<vmem>>, vector<1x128x128xbf16>
    %14 = vector.shape_cast %13 : vector<1x128x128xbf16> to vector<128x128xbf16>
    %15 = arith.extf %14 : vector<128x128xbf16> to vector<128x128xf32>
    %c1_10 = arith.constant 1 : index
    %16 = memref.load %arg4[%c1_10] : memref<8xf32, #tpu.memory_space<smem>>
    %17 = vector.broadcast %16 : f32 to vector<128x128xf32>
    %18 = arith.mulf %15, %17 : vector<128x128xf32>
    %cst_11 = arith.constant dense<0.000000e+00> : vector<8x128xf32>
    %19 = tpu.matmul %3, %18, %cst_11 {dimension_numbers = #tpu.dot_dimension_numbers<[1], [0], [0], [1], [0, 0, 1, 1], [], []>} : vector<8x128xf32>, vector<128x128xf32>, vector<8x128xf32> -> vector<8x128xf32>
    %20 = arith.addf %12, %19 : vector<8x128xf32>
    %c2 = arith.constant 2 : index
    %c0_12 = arith.constant 0 : index
    %c0_13 = arith.constant 0 : index
    %21 = vector.load %arg3[%c2, %c0_12, %c0_13] : memref<8x128x128xbf16, #tpu.memory_space<vmem>>, vector<1x128x128xbf16>
    %22 = vector.shape_cast %21 : vector<1x128x128xbf16> to vector<128x128xbf16>
    %23 = arith.extf %22 : vector<128x128xbf16> to vector<128x128xf32>
    %c2_14 = arith.constant 2 : index
    %24 = memref.load %arg4[%c2_14] : memref<8xf32, #tpu.memory_space<smem>>
    %25 = vector.broadcast %24 : f32 to vector<128x128xf32>
    %26 = arith.mulf %23, %25 : vector<128x128xf32>
    %cst_15 = arith.constant dense<0.000000e+00> : vector<8x128xf32>
    %27 = tpu.matmul %3, %26, %cst_15 {dimension_numbers = #tpu.dot_dimension_numbers<[1], [0], [0], [1], [0, 0, 1, 1], [], []>} : vector<8x128xf32>, vector<128x128xf32>, vector<8x128xf32> -> vector<8x128xf32>
    %28 = arith.addf %20, %27 : vector<8x128xf32>
    %c3 = arith.constant 3 : index
    %c0_16 = arith.constant 0 : index
    %c0_17 = arith.constant 0 : index
    %29 = vector.load %arg3[%c3, %c0_16, %c0_17] : memref<8x128x128xbf16, #tpu.memory_space<vmem>>, vector<1x128x128xbf16>
    %30 = vector.shape_cast %29 : vector<1x128x128xbf16> to vector<128x128xbf16>
    %31 = arith.extf %30 : vector<128x128xbf16> to vector<128x128xf32>
    %c3_18 = arith.constant 3 : index
    %32 = memref.load %arg4[%c3_18] : memref<8xf32, #tpu.memory_space<smem>>
    %33 = vector.broadcast %32 : f32 to vector<128x128xf32>
    %34 = arith.mulf %31, %33 : vector<128x128xf32>
    %cst_19 = arith.constant dense<0.000000e+00> : vector<8x128xf32>
    %35 = tpu.matmul %3, %34, %cst_19 {dimension_numbers = #tpu.dot_dimension_numbers<[1], [0], [0], [1], [0, 0, 1, 1], [], []>} : vector<8x128xf32>, vector<128x128xf32>, vector<8x128xf32> -> vector<8x128xf32>
    %36 = arith.addf %28, %35 : vector<8x128xf32>
    %c4 = arith.constant 4 : index
    %c0_20 = arith.constant 0 : index
    %c0_21 = arith.constant 0 : index
    %37 = vector.load %arg3[%c4, %c0_20, %c0_21] : memref<8x128x128xbf16, #tpu.memory_space<vmem>>, vector<1x128x128xbf16>
    %38 = vector.shape_cast %37 : vector<1x128x128xbf16> to vector<128x128xbf16>
    %39 = arith.extf %38 : vector<128x128xbf16> to vector<128x128xf32>
    %c4_22 = arith.constant 4 : index
    %40 = memref.load %arg4[%c4_22] : memref<8xf32, #tpu.memory_space<smem>>
    %41 = vector.broadcast %40 : f32 to vector<128x128xf32>
    %42 = arith.mulf %39, %41 : vector<128x128xf32>
    %cst_23 = arith.constant dense<0.000000e+00> : vector<8x128xf32>
    %43 = tpu.matmul %3, %42, %cst_23 {dimension_numbers = #tpu.dot_dimension_numbers<[1], [0], [0], [1], [0, 0, 1, 1], [], []>} : vector<8x128xf32>, vector<128x128xf32>, vector<8x128xf32> -> vector<8x128xf32>
    %44 = arith.addf %36, %43 : vector<8x128xf32>
    %c5 = arith.constant 5 : index
    %c0_24 = arith.constant 0 : index
    %c0_25 = arith.constant 0 : index
    %45 = vector.load %arg3[%c5, %c0_24, %c0_25] : memref<8x128x128xbf16, #tpu.memory_space<vmem>>, vector<1x128x128xbf16>
    %46 = vector.shape_cast %45 : vector<1x128x128xbf16> to vector<128x128xbf16>
    %47 = arith.extf %46 : vector<128x128xbf16> to vector<128x128xf32>
    %c5_26 = arith.constant 5 : index
    %48 = memref.load %arg4[%c5_26] : memref<8xf32, #tpu.memory_space<smem>>
    %49 = vector.broadcast %48 : f32 to vector<128x128xf32>
    %50 = arith.mulf %47, %49 : vector<128x128xf32>
    %cst_27 = arith.constant dense<0.000000e+00> : vector<8x128xf32>
    %51 = tpu.matmul %3, %50, %cst_27 {dimension_numbers = #tpu.dot_dimension_numbers<[1], [0], [0], [1], [0, 0, 1, 1], [], []>} : vector<8x128xf32>, vector<128x128xf32>, vector<8x128xf32> -> vector<8x128xf32>
    %52 = arith.addf %44, %51 : vector<8x128xf32>
    %c6 = arith.constant 6 : index
    %c0_28 = arith.constant 0 : index
    %c0_29 = arith.constant 0 : index
    %53 = vector.load %arg3[%c6, %c0_28, %c0_29] : memref<8x128x128xbf16, #tpu.memory_space<vmem>>, vector<1x128x128xbf16>
    %54 = vector.shape_cast %53 : vector<1x128x128xbf16> to vector<128x128xbf16>
    %55 = arith.extf %54 : vector<128x128xbf16> to vector<128x128xf32>
    %c6_30 = arith.constant 6 : index
    %56 = memref.load %arg4[%c6_30] : memref<8xf32, #tpu.memory_space<smem>>
    %57 = vector.broadcast %56 : f32 to vector<128x128xf32>
    %58 = arith.mulf %55, %57 : vector<128x128xf32>
    %cst_31 = arith.constant dense<0.000000e+00> : vector<8x128xf32>
    %59 = tpu.matmul %3, %58, %cst_31 {dimension_numbers = #tpu.dot_dimension_numbers<[1], [0], [0], [1], [0, 0, 1, 1], [], []>} : vector<8x128xf32>, vector<128x128xf32>, vector<8x128xf32> -> vector<8x128xf32>
    %60 = arith.addf %52, %59 : vector<8x128xf32>
    %c7 = arith.constant 7 : index
    %c0_32 = arith.constant 0 : index
    %c0_33 = arith.constant 0 : index
    %61 = vector.load %arg3[%c7, %c0_32, %c0_33] : memref<8x128x128xbf16, #tpu.memory_space<vmem>>, vector<1x128x128xbf16>
    %62 = vector.shape_cast %61 : vector<1x128x128xbf16> to vector<128x128xbf16>
    %63 = arith.extf %62 : vector<128x128xbf16> to vector<128x128xf32>
    %c7_34 = arith.constant 7 : index
    %64 = memref.load %arg4[%c7_34] : memref<8xf32, #tpu.memory_space<smem>>
    %65 = vector.broadcast %64 : f32 to vector<128x128xf32>
    %66 = arith.mulf %63, %65 : vector<128x128xf32>
    %cst_35 = arith.constant dense<0.000000e+00> : vector<8x128xf32>
    %67 = tpu.matmul %3, %66, %cst_35 {dimension_numbers = #tpu.dot_dimension_numbers<[1], [0], [0], [1], [0, 0, 1, 1], [], []>} : vector<8x128xf32>, vector<128x128xf32>, vector<8x128xf32> -> vector<8x128xf32>
    %68 = arith.addf %60, %67 : vector<8x128xf32>
    %c0_i32_36 = arith.constant 0 : i32
    %69 = arith.cmpi ne, %arg1, %c0_i32_36 : i32
    %70 = arith.extui %69 : i1 to i32
    %c0_i32_37 = arith.constant 0 : i32
    %71 = arith.cmpi ne, %70, %c0_i32_37 : i32
    scf.if %71 {
      %c0_40 = arith.constant 0 : index
      %c0_41 = arith.constant 0 : index
      %75 = vector.load %arg6[%c0_40, %c0_41] : memref<8x128xf32, #tpu.memory_space<vmem>>, vector<8x128xf32>
      tpu.vector_store %arg6[%c0_40, %c0_41], %68 {strides = array<i32>} : memref<8x128xf32, #tpu.memory_space<vmem>>, vector<8x128xf32>,
    } else {
    }
    %c0_i32_38 = arith.constant 0 : i32
    %72 = arith.cmpi eq, %arg1, %c0_i32_38 : i32
    %73 = arith.extui %72 : i1 to i32
    %c0_i32_39 = arith.constant 0 : i32
    %74 = arith.cmpi ne, %73, %c0_i32_39 : i32
    scf.if %74 {
      %c0_40 = arith.constant 0 : index
      %c0_41 = arith.constant 0 : index
      %75 = vector.load %arg5[%c0_40, %c0_41] : memref<1x128xf32, #tpu.memory_space<vmem>>, vector<1x128xf32>
      %76 = vector.broadcast %75 : vector<1x128xf32> to vector<8x128xf32>
      %77 = arith.addf %68, %76 : vector<8x128xf32>
      %78 = arith.negf %77 : vector<8x128xf32>
      %79 = math.exp %78 : vector<8x128xf32>
      %cst_42 = arith.constant 1.000000e+00 : f32
      %80 = vector.broadcast %cst_42 : f32 to vector<8x128xf32>
      %81 = arith.addf %80, %79 : vector<8x128xf32>
      %82 = arith.divf %80, %81 : vector<8x128xf32>
      %c0_43 = arith.constant 0 : index
      %c0_44 = arith.constant 0 : index
      %83 = vector.load %arg6[%c0_43, %c0_44] : memref<8x128xf32, #tpu.memory_space<vmem>>, vector<8x128xf32>
      tpu.vector_store %arg6[%c0_43, %c0_44], %82 {strides = array<i32>} : memref<8x128xf32, #tpu.memory_space<vmem>>, vector<8x128xf32>,
    } else {
    }
    return
  }
  func.func @transform_0(%arg0: i32, %arg1: i32) -> (i32, i32) {
    %c0_i32 = arith.constant 0 : i32
    %c0_i32_0 = arith.constant 0 : i32
    return %c0_i32, %arg1 : i32, i32
  }
  func.func @transform_1(%arg0: i32, %arg1: i32) -> (i32, i32, i32) {
    %c0_i32 = arith.constant 0 : i32
    %c0_i32_0 = arith.constant 0 : i32
    return %c0_i32, %arg1, %arg0 : i32, i32, i32
  }
  func.func @transform_2(%arg0: i32, %arg1: i32) -> i32 {
    %c0_i32 = arith.constant 0 : i32
    %c0_i32_0 = arith.constant 0 : i32
    return %c0_i32 : i32
  }
  func.func @transform_3(%arg0: i32, %arg1: i32) -> (i32, i32) {
    %c0_i32 = arith.constant 0 : i32
    %c0_i32_0 = arith.constant 0 : i32
    return %c0_i32, %arg0 : i32, i32
  }
  func.func @transform_4(%arg0: i32, %arg1: i32) -> (i32, i32) {
    %c0_i32 = arith.constant 0 : i32
    %c0_i32_0 = arith.constant 0 : i32
    return %c0_i32, %arg0 : i32, i32
  }
}

</mosaic_0001>

<bundles_post_ra>
// kernel: auglag_forward.1
= control target key start
LH: loop header
LB: loop body
LE: loop exit
PB: predicated region body
PF: predicated region fallthrough
CT: control target
= control target key end

     0   :  { %9 = vsyncpa [#allocation3], 0  ;;  %s2235_s0 = inlined_call_operand.vmem [shape: f32[8,128], index: 0, kind: input, shape index: {}]   ;;  %s2236_s1 = inlined_call_operand.hbm [shape: bf16[8,128,128], index: 1, kind: input, shape index: {}]   ;;  %s2237_s2 = inlined_call_operand.vmem [shape: f32[8], index: 2, kind: input, shape index: {}]   ;;  %s2238_s3 = inlined_call_operand.vmem [shape: f32[1,128], index: 3, kind: input, shape index: {}]   ;;  %s2239_s4 = inlined_call_operand.hbm [shape: f32[8,128], index: 4, kind: output, shape index: {}]  }
   0x1   :  { %10 = vsyncpa [#allocation5], 0 }
   0x2   :  { %11 = vsyncpa [#allocation4], 0  ;;  %s1872_s15 = smov [#allocation2]   ;;  %s32_s19 = sshll.u32 %s2237_s2, 4  ;;  %s33_s19 = int_to_ptr.vmem [resolvable:$true] %s32_s19 }
   0x3   :  { %s19_s16 = sshll.u32 %s1872_s15, 4  ;;  %s20_s16 = int_to_ptr.vmem [resolvable:$true] %s19_s16 }
   0x4   :  { %s1822_s20 = scalar_lea.vmem %s20_s16, 8192  ;;  %p1827_p1 = scmp.lt.s32.totalorder %s20_s16, %s20_s16 }
   0x5   :  { %p1823_p0 = scmp.ne.s32.totalorder %s20_s16, %s1822_s20  ;;  %p1828_p2 = scmp.lt.s32.totalorder %s1822_s20, %s1822_s20 }
   0x7   :  { %p1829_p3 = por %p1828_p2, %p1827_p1 }
   0x9   :  { %p1830_p4 = pnand %p1829_p3, %p1823_p0 }
   0xb   :  { %1833 = shalt.err (!%p1830_p4)
}
   0xc   :  { %s1873_s21 = smov 64   ;;  %s1874_s22 = smov 4  }
   0xd   :  { %25 = dma.hbm_to_vmem [thread:$0]  %s2236_s1, 8192, %s20_s16, [#allocation3], %s1873_s21, %s1873_s21, %s1874_s22  }
   0xe   :  { %s1834_s25 = scalar_lea.vmem %s33_s19, 16  ;;  %p1839_p6 = scmp.lt.s32.totalorder %s33_s19, %s33_s19 }
   0xf   :  { %p1835_p5 = scmp.ne.s32.totalorder %s33_s19, %s1834_s25  ;;  %p1840_p7 = scmp.lt.s32.totalorder %s1834_s25, %s1834_s25 }
  0x11   :  { %p1841_p8 = por %p1840_p7, %p1839_p6 }
  0x13   :  { %p1842_p9 = pnand %p1841_p8, %p1835_p5 }
  0x15   :  { %1845 = shalt.err (!%p1842_p9)
}
  0x16   :  { %s1875_s2 = smov [#allocation6]  }
  0x17   :  { %35 = dma.vmem_to_smem %s33_s19, 16, %s1875_s2, [#allocation5]  }
  0x18   :  { %1866 = dma.done.wait [#allocation3], 8192  }
  0x19   :  { %1867 = vsyncadd [#allocation3], 4294959104 }
  0x1a   :  { %1868 = dma.done.wait [#allocation5], 16  }
  0x1b   :  { %1869 = vsyncadd [#allocation5], 4294967280 }
  0x1c   :  { %44 = sfence }
  0x1d   :  { %v1337_v0 = vld [vmem:[#allocation2 + $0x38] sm:$0xff]   ;;  %s84_s26 = sld [smem:[#allocation6]]  ;;  %v1876_v1 = vmov 0.0   ;;  %v1336_v3 = vld [vmem:[#allocation2 + $0x30] sm:$0xff]   ;;  %v1335_v12 = vld [vmem:[#allocation2 + $0x28] sm:$0xff]   ;;  %vm1877_vm0 = vmmov 0  }
  0x1e   :  { %1523 = vmatprep.subr.mxu0 %v1876_v1  ;;  %1558 = vmatprep.subr.mxu1 %v1876_v1  ;;  %v1344_v2 = vld [vmem:[#allocation2 + $0x78] sm:$0xff]   ;;  %s1066_s1 = sld [smem:[#allocation6 + $0x1]]  ;;  %v1105_v4 = vunpack.c.l.bf16 %v1337_v0  ;;  %v1106_v5 = vunpack.c.h.bf16 %v1337_v0  ;;  %v1343_v6 = vld [vmem:[#allocation2 + $0x70] sm:$0xff]   ;;  %v1102_v9 = vunpack.c.h.bf16 %v1336_v3  ;;  %v1101_v16 = vunpack.c.l.bf16 %v1336_v3  ;;  %v1342_v17 = vld [vmem:[#allocation2 + $0x68] sm:$0xff]   ;;  %s1878_s10 = smov [#allocation7]  }
  0x1f   :  { %v1137_v7 = vunpack.c.l.bf16 %v1344_v2  ;;  %v1138_v8 = vunpack.c.h.bf16 %v1344_v2  ;;  %v1134_v11 = vunpack.c.h.bf16 %v1343_v6  ;;  %v1133_v20 = vunpack.c.l.bf16 %v1343_v6  ;;  %v1334_v25 = vld [vmem:[#allocation2 + $0x20] sm:$0xff]   ;;  %v1333_v35 = vld [vmem:[#allocation2 + $0x18] sm:$0xff]   ;;  %v1332_v45 = vld [vmem:[#allocation2 + $0x10] sm:$0xff]   ;;  %s1959_s27 = sld [smem:[#allocation6 + $0x2]]  ;;  %1555 = vmatprep.mubr.msk.f32.mxu0 %vm1877_vm0, %v1876_v1  ;;  %1590 = vmatprep.mubr.msk.f32.mxu1 %vm1877_vm0, %v1876_v1  ;;  %s1056_s11 = sshll.u32 %s1878_s10, 4  ;;  %s1057_s11 = int_to_ptr.vmem [resolvable:$true] %s1056_s11 }
  0x20   :  { %v1098_v22 = vunpack.c.h.bf16 %v1335_v12  ;;  %v1130_v24 = vunpack.c.h.bf16 %v1342_v17  ;;  %v1097_v27 = vunpack.c.l.bf16 %v1335_v12  ;;  %v1341_v28 = vld [vmem:[#allocation2 + $0x60] sm:$0xff]   ;;  %v1129_v30 = vunpack.c.l.bf16 %v1342_v17  ;;  %v1340_v38 = vld [vmem:[#allocation2 + $0x58] sm:$0xff]   ;;  %v1339_v48 = vld [vmem:[#allocation2 + $0x50] sm:$0xff]   ;;  %s1963_s28 = sld [smem:[#allocation6 + $0x3]]  ;;  %s1846_s12 = scalar_lea.vmem %s1057_s11, 128 }
  0x21   :  { %v1094_v32 = vunpack.c.h.bf16 %v1334_v25  ;;  %v1126_v34 = vunpack.c.h.bf16 %v1341_v28  ;;  %v1093_v37 = vunpack.c.l.bf16 %v1334_v25  ;;  %v1125_v40 = vunpack.c.l.bf16 %v1341_v28  ;;  %v1331_v55 = vld [vmem:[#allocation2 + $0x8] sm:$0xff]   ;;  %v1076_v2 = vld [vmem:[#allocation2] sm:$0xff]   ;;  %s2048_s5 = sld [smem:[#allocation6 + $0x5]]  ;;  %p1847_p10 = scmp.ne.s32.totalorder %s1057_s11, %s1846_s12 }
  0x22   :  { %v1090_v42 = vunpack.c.h.bf16 %v1333_v35  ;;  %v1122_v44 = vunpack.c.h.bf16 %v1340_v38  ;;  %v1089_v47 = vunpack.c.l.bf16 %v1333_v35  ;;  %v1121_v50 = vunpack.c.l.bf16 %v1340_v38  ;;  %v1338_v58 = vld [vmem:[#allocation2 + $0x48] sm:$0xff]   ;;  %s2124_s6 = sld [smem:[#allocation6 + $0x6]]  ;;  %p1851_p11 = scmp.lt.s32.totalorder %s1057_s11, %s1057_s11 }
  0x23   :  { %v1912_v10 = vstv %s84_s26  ;;  %v1086_v52 = vunpack.c.h.bf16 %v1332_v45  ;;  %v1118_v54 = vunpack.c.h.bf16 %v1339_v48  ;;  %v1085_v57 = vunpack.c.l.bf16 %v1332_v45  ;;  %v1349_v35 = vld [vmem:[#allocation2 + $0xa8] sm:$0xff]   ;;  %v1348_v45 = vld [vmem:[#allocation2 + $0xa0] sm:$0xff]   ;;  %s2128_s7 = sld [smem:[#allocation6 + $0x7]]  ;;  %p1852_p12 = scmp.lt.s32.totalorder %s1846_s12, %s1846_s12 }
  0x24   :  { %v101_v13 = vmul.f32 %v1106_v5, %v1912_v10  ;;  %v1915_v14 = vstv %s1066_s1  ;;  %v100_v15 = vmul.f32 %v1105_v4, %v1912_v10  ;;  %v99_v21 = vmul.f32 %v1102_v9, %v1912_v10  ;;  %v1108_v5 = vld [vmem:[#allocation2 + $0x40] sm:$0xff]   ;;  %v1356_v38 = vld [vmem:[#allocation2 + $0xe8] sm:$0xff]  }
  0x25   :  { %v223_v18 = vmul.f32 %v1138_v8, %v1915_v14  ;;  %v222_v19 = vmul.f32 %v1137_v7, %v1915_v14  ;;  %v221_v23 = vmul.f32 %v1134_v11, %v1915_v14  ;;  %v98_v26 = vmul.f32 %v1101_v16, %v1912_v10  ;;  %p1853_p13 = por %p1852_p12, %p1851_p11 }
  0x26   :  { %1524 = vmatpush3.msra.mxu0 %v101_v13  ;;  %v220_v29 = vmul.f32 %v1133_v20, %v1915_v14  ;;  %v97_v31 = vmul.f32 %v1098_v22, %v1912_v10  ;;  %v219_v33 = vmul.f32 %v1130_v24, %v1915_v14  ;;  %v96_v36 = vmul.f32 %v1097_v27, %v1912_v10  ;;  %v1358_v20 = vld [vmem:[#allocation2 + $0xf8] sm:$0xff]   ;;  %v1350_v27 = vld [vmem:[#allocation2 + $0xb0] sm:$0xff]  }
  0x27   :  { %1559 = vmatpush3.msra.mxu1 %v223_v18  ;;  %1525 = vmatprep.subr.mxu0 %v1876_v1  ;;  %v218_v39 = vmul.f32 %v1129_v30, %v1915_v14  ;;  %v95_v41 = vmul.f32 %v1094_v32, %v1912_v10  ;;  %v217_v43 = vmul.f32 %v1126_v34, %v1915_v14  ;;  %v1117_v60 = vunpack.c.l.bf16 %v1339_v48  ;;  %v1351_v18 = vld [vmem:[#allocation2 + $0xb8] sm:$0xff]   ;;  %v1357_v30 = vld [vmem:[#allocation2 + $0xf0] sm:$0xff]   ;;  %v1355_v48 = vld [vmem:[#allocation2 + $0xe0] sm:$0xff]   ;;  %p1854_p0 = pnand %p1853_p13, %p1847_p10 }
  0x28   :  { %1560 = vmatprep.subr.mxu1 %v1876_v1  ;;  %1526 = vmatpush3.msra.mxu0 %v100_v15  ;;  %v94_v46 = vmul.f32 %v1093_v37, %v1912_v10  ;;  %v216_v49 = vmul.f32 %v1125_v40, %v1915_v14  ;;  %v93_v51 = vmul.f32 %v1090_v42, %v1912_v10  ;;  %v1082_v62 = vunpack.c.h.bf16 %v1331_v55 }
  0x29   :  { %1561 = vmatpush3.msra.mxu1 %v222_v19  ;;  %1527 = vmatprep.subr.mxu0 %v1876_v1  ;;  %v215_v53 = vmul.f32 %v1122_v44, %v1915_v14  ;;  %v92_v56 = vmul.f32 %v1089_v47, %v1912_v10  ;;  %v214_v59 = vmul.f32 %v1121_v50, %v1915_v14  ;;  %v1114_v0 = vunpack.c.h.bf16 %v1338_v58 }
  0x2a   :  { %1562 = vmatprep.subr.mxu1 %v1876_v1  ;;  %1528 = vmatpush3.msra.mxu0 %v99_v21  ;;  %v91_v61 = vmul.f32 %v1086_v52, %v1912_v10  ;;  %v213_v63 = vmul.f32 %v1118_v54, %v1915_v14  ;;  %v90_v3 = vmul.f32 %v1085_v57, %v1912_v10  ;;  %v1081_v4 = vunpack.c.l.bf16 %v1331_v55  ;;  %v1347_v55 = vld [vmem:[#allocation2 + $0x98] sm:$0xff]  }
  0x2b   :  { %1563 = vmatpush3.msra.mxu1 %v221_v23  ;;  %1529 = vmatprep.subr.mxu0 %v1876_v1  ;;  %v212_v6 = vmul.f32 %v1117_v60, %v1915_v14  ;;  %v1113_v7 = vunpack.c.l.bf16 %v1338_v58  ;;  %v89_v8 = vmul.f32 %v1082_v62, %v1912_v10  ;;  %v1078_v9 = vunpack.c.h.bf16 %v1076_v2  ;;  %v1354_v58 = vld [vmem:[#allocation2 + $0xd8] sm:$0xff]  }
  0x2c   :  { %1564 = vmatprep.subr.mxu1 %v1876_v1  ;;  %1530 = vmatpush3.msra.mxu0 %v98_v26  ;;  %v211_v11 = vmul.f32 %v1114_v0, %v1915_v14  ;;  %v1110_v12 = vunpack.c.h.bf16 %v1108_v5  ;;  %v88_v13 = vmul.f32 %v1081_v4, %v1912_v10  ;;  %v1077_v15 = vunpack.c.l.bf16 %v1076_v2  ;;  %v1346_v2 = vld [vmem:[#allocation2 + $0x90] sm:$0xff]  }
  0x2d   :  { %1565 = vmatpush3.msra.mxu1 %v220_v29  ;;  %1531 = vmatprep.subr.mxu0 %v1876_v1  ;;  %v210_v16 = vmul.f32 %v1113_v7, %v1915_v14  ;;  %v1109_v17 = vunpack.c.l.bf16 %v1108_v5  ;;  %v87_v19 = vmul.f32 %v1078_v9, %v1912_v10  ;;  %v1170_v23 = vunpack.c.h.bf16 %v1351_v18  ;;  %v1353_v5 = vld [vmem:[#allocation2 + $0xd0] sm:$0xff]  }
  0x2e   :  { %1566 = vmatprep.subr.mxu1 %v1876_v1  ;;  %1532 = vmatpush3.msra.mxu0 %v97_v31  ;;  %v209_v21 = vmul.f32 %v1110_v12, %v1915_v14  ;;  %v86_v22 = vmul.f32 %v1077_v15, %v1912_v10  ;;  %v1980_v25 = vstv %s1959_s27  ;;  %v1202_v26 = vunpack.c.h.bf16 %v1358_v20  ;;  %v1990_v10 = vld [vmem:[%s2235_s0] sm:$0xff]  ;;  %s2044_s0 = sld [smem:[#allocation6 + $0x4]] }
  0x2f   :  { %1567 = vmatpush3.msra.mxu1 %v219_v33  ;;  %1533 = vmatprep.subr.mxu0 %v1876_v1  ;;  %v208_v24 = vmul.f32 %v1109_v17, %v1915_v14  ;;  %v1984_v28 = vstv %s1963_s28  ;;  %v1169_v29 = vunpack.c.l.bf16 %v1351_v18  ;;  %v1201_v14 = vunpack.c.l.bf16 %v1358_v20  ;;  %v1352_v17 = vld [vmem:[#allocation2 + $0xc8] sm:$0xff]  }
  0x30   :  { %1568 = vmatprep.subr.mxu1 %v1876_v1  ;;  %1534 = vmatpush3.msra.mxu0 %v96_v36  ;;  %v345_v31 = vmul.f32 %v1170_v23, %v1980_v25  ;;  %v1166_v32 = vunpack.c.h.bf16 %v1350_v27  ;;  %v467_v33 = vmul.f32 %v1202_v26, %v1984_v28  ;;  %v1198_v34 = vunpack.c.h.bf16 %v1357_v30 }
  0x31   :  { %1569 = vmatpush3.msra.mxu1 %v218_v39  ;;  %1535 = vmatprep.subr.mxu0 %v1876_v1  ;;  %v344_v36 = vmul.f32 %v1169_v29, %v1980_v25  ;;  %v1165_v37 = vunpack.c.l.bf16 %v1350_v27  ;;  %v466_v39 = vmul.f32 %v1201_v14, %v1984_v28  ;;  %v1197_v40 = vunpack.c.l.bf16 %v1357_v30  ;;  %v1172_v29 = vld [vmem:[#allocation2 + $0xc0] sm:$0xff]  }
  0x32   :  { %1570 = vmatprep.subr.mxu1 %v1876_v1  ;;  %1536 = vmatpush3.msra.mxu0 %v95_v41  ;;  %v343_v41 = vmul.f32 %v1166_v32, %v1980_v25  ;;  %v1162_v42 = vunpack.c.h.bf16 %v1349_v35  ;;  %v1194_v44 = vunpack.c.h.bf16 %v1356_v38  ;;  %v1161_v47 = vunpack.c.l.bf16 %v1349_v35 }
  0x33   :  { %1571 = vmatpush3.msra.mxu1 %v217_v43  ;;  %1537 = vmatprep.subr.mxu0 %v1876_v1  ;;  %v465_v43 = vmul.f32 %v1198_v34, %v1984_v28  ;;  %v1193_v50 = vunpack.c.l.bf16 %v1356_v38  ;;  %v1158_v52 = vunpack.c.h.bf16 %v1348_v45  ;;  %v1190_v54 = vunpack.c.h.bf16 %v1355_v48 }
  0x34   :  { %1572 = vmatprep.subr.mxu1 %v1876_v1  ;;  %1538 = vmatpush3.msra.mxu0 %v94_v46  ;;  %v342_v46 = vmul.f32 %v1165_v37, %v1980_v25  ;;  %v1157_v57 = vunpack.c.l.bf16 %v1348_v45  ;;  %v1189_v60 = vunpack.c.l.bf16 %v1355_v48  ;;  %v1154_v62 = vunpack.c.h.bf16 %v1347_v55  ;;  %v1364_v48 = vld [vmem:[#allocation2 + $0x130] sm:$0xff]  }
  0x35   :  { %1573 = vmatpush3.msra.mxu1 %v216_v49  ;;  %1539 = vmatprep.subr.mxu0 %v1876_v1  ;;  %v464_v49 = vmul.f32 %v1197_v40, %v1984_v28  ;;  %v1186_v0 = vunpack.c.h.bf16 %v1354_v58  ;;  %v1153_v4 = vunpack.c.l.bf16 %v1347_v55  ;;  %v1185_v7 = vunpack.c.l.bf16 %v1354_v58  ;;  %v1363_v55 = vld [vmem:[#allocation2 + $0x128] sm:$0xff]  }
  0x36   :  { %1574 = vmatprep.subr.mxu1 %v1876_v1  ;;  %1540 = vmatpush3.msra.mxu0 %v93_v51  ;;  %v341_v51 = vmul.f32 %v1162_v42, %v1980_v25  ;;  %v1150_v9 = vunpack.c.h.bf16 %v1346_v2  ;;  %v1182_v12 = vunpack.c.h.bf16 %v1353_v5  ;;  %v1178_v23 = vunpack.c.h.bf16 %v1352_v17  ;;  %v1370_v58 = vld [vmem:[#allocation2 + $0x168] sm:$0xff]  }
  0x37   :  { %1575 = vmatpush3.msra.mxu1 %v215_v53  ;;  %1541 = vmatprep.subr.mxu0 %v1876_v1  ;;  %v463_v53 = vmul.f32 %v1194_v44, %v1984_v28  ;;  %v336_v15 = vmul.f32 %v1153_v4, %v1980_v25  ;;  %v458_v18 = vmul.f32 %v1185_v7, %v1984_v28  ;;  %v1177_v14 = vunpack.c.l.bf16 %v1352_v17  ;;  %v1368_v17 = vld [vmem:[#allocation2 + $0x158] sm:$0xff]  }
  0x38   :  { %1576 = vmatprep.subr.mxu1 %v1876_v1  ;;  %1542 = vmatpush3.msra.mxu0 %v92_v56  ;;  %v340_v56 = vmul.f32 %v1161_v47, %v1980_v25  ;;  %v335_v20 = vmul.f32 %v1150_v9, %v1980_v25  ;;  %v1174_v34 = vunpack.c.h.bf16 %v1172_v29  ;;  %v1173_v38 = vunpack.c.l.bf16 %v1172_v29  ;;  %v1367_v29 = vld [vmem:[#allocation2 + $0x150] sm:$0xff]  }
  0x39   :  { %1577 = vmatpush3.msra.mxu1 %v214_v59  ;;  %1543 = vmatprep.subr.mxu0 %v1876_v1  ;;  %v462_v59 = vmul.f32 %v1193_v50, %v1984_v28  ;;  %v454_v37 = vmul.f32 %v1177_v14, %v1984_v28  ;;  %v1225_v4 = vunpack.c.l.bf16 %v1363_v55  ;;  %v1257_v7 = vunpack.c.l.bf16 %v1370_v58 }
  0x3a   :  { %1578 = vmatprep.subr.mxu1 %v1876_v1  ;;  %1544 = vmatpush3.msra.mxu0 %v91_v61  ;;  %v339_v61 = vmul.f32 %v1158_v52, %v1980_v25  ;;  %v453_v42 = vmul.f32 %v1174_v34, %v1984_v28  ;;  %v452_v45 = vmul.f32 %v1173_v38, %v1984_v28  ;;  %v1230_v52 = vunpack.c.h.bf16 %v1364_v48  ;;  %v1366_v38 = vld [vmem:[#allocation2 + $0x148] sm:$0xff]  }
  0x3b   :  { %1579 = vmatpush3.msra.mxu1 %v213_v63  ;;  %1545 = vmatprep.subr.mxu0 %v1876_v1  ;;  %v461_v63 = vmul.f32 %v1190_v54, %v1984_v28  ;;  %v1249_v14 = vunpack.c.l.bf16 %v1368_v17  ;;  %v1246_v34 = vunpack.c.h.bf16 %v1367_v29 }
  0x3c   :  { %1580 = vmatprep.subr.mxu1 %v1876_v1  ;;  %1546 = vmatpush3.msra.mxu0 %v90_v3  ;;  %v338_v3 = vmul.f32 %v1157_v57, %v1980_v25  ;;  %v1229_v57 = vunpack.c.l.bf16 %v1364_v48 }
  0x3d   :  { %1581 = vmatpush3.msra.mxu1 %v212_v6  ;;  %1547 = vmatprep.subr.mxu0 %v1876_v1  ;;  %v460_v6 = vmul.f32 %v1189_v60, %v1984_v28 }
  0x3e   :  { %1582 = vmatprep.subr.mxu1 %v1876_v1  ;;  %1548 = vmatpush3.msra.mxu0 %v89_v8  ;;  %v337_v8 = vmul.f32 %v1154_v62, %v1980_v25  ;;  %v1226_v62 = vunpack.c.h.bf16 %v1363_v55 }
  0x3f   :  { %1583 = vmatpush3.msra.mxu1 %v211_v11  ;;  %1549 = vmatprep.subr.mxu0 %v1876_v1  ;;  %v459_v11 = vmul.f32 %v1186_v0, %v1984_v28  ;;  %v1258_v0 = vunpack.c.h.bf16 %v1370_v58 }
  0x40   :  { %1584 = vmatprep.subr.mxu1 %v1876_v1  ;;  %1550 = vmatpush3.msra.mxu0 %v88_v13  ;;  %v1345_v13 = vld [vmem:[#allocation2 + $0x88] sm:$0xff]  }
  0x41   :  { %1585 = vmatpush3.msra.mxu1 %v210_v16  ;;  %1551 = vmatprep.subr.mxu0 %v1876_v1  ;;  %v1149_v16 = vunpack.c.l.bf16 %v1346_v2  ;;  %v1145_v27 = vunpack.c.l.bf16 %v1345_v13  ;;  %v1362_v2 = vld [vmem:[#allocation2 + $0x120] sm:$0xff]  }
  0x42   :  { %1586 = vmatprep.subr.mxu1 %v1876_v1  ;;  %1552 = vmatpush3.msra.mxu0 %v87_v19  ;;  %v1181_v19 = vunpack.c.l.bf16 %v1353_v5  ;;  %v1369_v5 = vld [vmem:[#allocation2 + $0x160] sm:$0xff]   ;;  %v1222_v9 = vunpack.c.h.bf16 %v1362_v2 }
  0x43   :  { %1587 = vmatpush3.msra.mxu1 %v209_v21  ;;  %1553 = vmatprep.subr.mxu0 %v1876_v1  ;;  %v1146_v21 = vunpack.c.h.bf16 %v1345_v13  ;;  %v334_v26 = vmul.f32 %v1149_v16, %v1980_v25  ;;  %v332_v35 = vmul.f32 %v1145_v27, %v1980_v25  ;;  %v1361_v13 = vld [vmem:[#allocation2 + $0x118] sm:$0xff]   ;;  %v1221_v16 = vunpack.c.l.bf16 %v1362_v2 }
  0x44   :  { %1588 = vmatprep.subr.mxu1 %v1876_v1  ;;  %1554 = vmatpush3.msra.mxu0 %v86_v22  ;;  %v457_v22 = vmul.f32 %v1182_v12, %v1984_v28  ;;  %v456_v30 = vmul.f32 %v1181_v19, %v1984_v28  ;;  %v1254_v12 = vunpack.c.h.bf16 %v1369_v5  ;;  %v1253_v19 = vunpack.c.l.bf16 %v1369_v5  ;;  %v1378_v5 = vld [vmem:[#allocation2 + $0x1b0] sm:$0xff]  }
  0x45   :  { %1589 = vmatpush3.msra.mxu1 %v208_v24  ;;  %1556 = vmatmul.mubr.f32.vlgmr.msra.gmra.mxu0 %v1990_v10  ;;  %v1140_v24 = vld [vmem:[#allocation2 + $0x80] sm:$0xff]   ;;  %v1217_v27 = vunpack.c.l.bf16 %v1361_v13 }
  0x46   :  { %1593 = vmatprep.subr.mxu0 %v1876_v1  ;;  %1628 = vmatprep.subr.mxu1 %v1876_v1  ;;  %v1142_v32 = vunpack.c.h.bf16 %v1140_v24 }
  0x47   :  { %1591 = vmatmul.mubr.f32.vlgmr.msra.gmra.mxu1 %v1990_v10  ;;  %1594 = vmatpush3.msra.mxu0 %v345_v31  ;;  %v333_v31 = vmul.f32 %v1146_v21, %v1980_v25  ;;  %v1218_v21 = vunpack.c.h.bf16 %v1361_v13  ;;  %v1377_v13 = vld [vmem:[#allocation2 + $0x1a8] sm:$0xff]  }
  0x48   :  { %1629 = vmatpush3.msra.mxu1 %v467_v33  ;;  %1595 = vmatprep.subr.mxu0 %v1876_v1  ;;  %v455_v33 = vmul.f32 %v1178_v23, %v1984_v28  ;;  %v331_v40 = vmul.f32 %v1142_v32, %v1980_v25  ;;  %v1250_v23 = vunpack.c.h.bf16 %v1368_v17  ;;  %v1384_v17 = vld [vmem:[#allocation2 + $0x1e8] sm:$0xff]  }
  0x49   :  { %1630 = vmatprep.subr.mxu1 %v1876_v1  ;;  %1596 = vmatpush3.msra.mxu0 %v344_v36  ;;  %v1141_v36 = vunpack.c.l.bf16 %v1140_v24  ;;  %v1360_v24 = vld [vmem:[#allocation2 + $0x110] sm:$0xff]  }
  0x4a   :  { %1631 = vmatpush3.msra.mxu1 %v466_v39  ;;  %1597 = vmatprep.subr.mxu0 %v1876_v1  ;;  %v1365_v39 = vld [vmem:[#allocation2 + $0x138] sm:$0xff]   ;;  %v1214_v32 = vunpack.c.h.bf16 %v1360_v24 }
  0x4b   :  { %1632 = vmatprep.subr.mxu1 %v1876_v1  ;;  %1598 = vmatpush3.msra.mxu0 %v343_v41  ;;  %v1372_v41 = vld [vmem:[#allocation2 + $0x178] sm:$0xff]   ;;  %v1234_v44 = vunpack.c.h.bf16 %v1365_v39  ;;  %v1233_v50 = vunpack.c.l.bf16 %v1365_v39 }
  0x4c   :  { %1633 = vmatpush3.msra.mxu1 %v465_v43  ;;  %1599 = vmatprep.subr.mxu0 %v1876_v1  ;;  %v330_v43 = vmul.f32 %v1141_v36, %v1980_v25  ;;  %v1266_v47 = vunpack.c.h.bf16 %v1372_v41  ;;  %v1265_v25 = vunpack.c.l.bf16 %v1372_v41 }
  0x4d   :  { %1634 = vmatprep.subr.mxu1 %v1876_v1  ;;  %1600 = vmatpush3.msra.mxu0 %v342_v46  ;;  %v2065_v46 = vstv %s2044_s0 }
  0x4e   :  { %1635 = vmatpush3.msra.mxu1 %v464_v49  ;;  %1601 = vmatprep.subr.mxu0 %v1876_v1  ;;  %v2069_v49 = vstv %s2048_s5  ;;  %v589_v28 = vmul.f32 %v1234_v44, %v2065_v46  ;;  %v580_v36 = vmul.f32 %v1217_v27, %v2065_v46  ;;  %v579_v41 = vmul.f32 %v1214_v32, %v2065_v46 }
  0x4f   :  { %1636 = vmatprep.subr.mxu1 %v1876_v1  ;;  %1602 = vmatpush3.msra.mxu0 %v341_v51  ;;  %v1371_v51 = vld [vmem:[#allocation2 + $0x170] sm:$0xff]   ;;  %v702_v39 = vmul.f32 %v1249_v14, %v2069_v49  ;;  %v1242_v44 = vunpack.c.h.bf16 %v1366_v38  ;;  %v1289_v27 = vunpack.c.l.bf16 %v1377_v13  ;;  %v1321_v14 = vunpack.c.l.bf16 %v1384_v17 }
  0x50   :  { %1637 = vmatpush3.msra.mxu1 %v463_v53  ;;  %1603 = vmatprep.subr.mxu0 %v1876_v1  ;;  %v711_v53 = vmul.f32 %v1266_v47, %v2069_v49  ;;  %v1262_v54 = vunpack.c.h.bf16 %v1371_v51  ;;  %v1261_v60 = vunpack.c.l.bf16 %v1371_v51 }
  0x51   :  { %1638 = vmatprep.subr.mxu1 %v1876_v1  ;;  %1604 = vmatpush3.msra.mxu0 %v340_v56  ;;  %v588_v56 = vmul.f32 %v1233_v50, %v2065_v46  ;;  %v1236_v50 = vld [vmem:[#allocation2 + $0x140] sm:$0xff]  }
  0x52   :  { %1639 = vmatpush3.msra.mxu1 %v462_v59  ;;  %1605 = vmatprep.subr.mxu0 %v1876_v1  ;;  %v710_v59 = vmul.f32 %v1265_v25, %v2069_v49  ;;  %v1241_v25 = vunpack.c.l.bf16 %v1366_v38  ;;  %v1237_v58 = vunpack.c.l.bf16 %v1236_v50  ;;  %v1382_v38 = vld [vmem:[#allocation2 + $0x1d8] sm:$0xff]  }
  0x53   :  { %1640 = vmatprep.subr.mxu1 %v1876_v1  ;;  %1606 = vmatpush3.msra.mxu0 %v339_v61  ;;  %v587_v61 = vmul.f32 %v1230_v52, %v2065_v46 }
  0x54   :  { %1641 = vmatpush3.msra.mxu1 %v461_v63  ;;  %1607 = vmatprep.subr.mxu0 %v1876_v1  ;;  %v709_v63 = vmul.f32 %v1262_v54, %v2069_v49  ;;  %v1238_v54 = vunpack.c.h.bf16 %v1236_v50  ;;  %v696_v2 = vmul.f32 %v1237_v58, %v2069_v49  ;;  %v1381_v50 = vld [vmem:[#allocation2 + $0x1d0] sm:$0xff]   ;;  %v1380_v58 = vld [vmem:[#allocation2 + $0x1c8] sm:$0xff]  }
  0x55   :  { %1642 = vmatprep.subr.mxu1 %v1876_v1  ;;  %1608 = vmatpush3.msra.mxu0 %v338_v3  ;;  %v586_v3 = vmul.f32 %v1229_v57, %v2065_v46  ;;  %v698_v57 = vmul.f32 %v1241_v25, %v2069_v49  ;;  %v1313_v25 = vunpack.c.l.bf16 %v1382_v38 }
  0x56   :  { %1643 = vmatpush3.msra.mxu1 %v460_v6  ;;  %1609 = vmatprep.subr.mxu0 %v1876_v1  ;;  %v708_v6 = vmul.f32 %v1261_v60, %v2069_v49 }
  0x57   :  { %1644 = vmatprep.subr.mxu1 %v1876_v1  ;;  %1610 = vmatpush3.msra.mxu0 %v337_v8  ;;  %v585_v8 = vmul.f32 %v1226_v62, %v2065_v46  ;;  %v697_v62 = vmul.f32 %v1238_v54, %v2069_v49  ;;  %v1310_v54 = vunpack.c.h.bf16 %v1381_v50 }
  0x58   :  { %1645 = vmatpush3.msra.mxu1 %v459_v11  ;;  %1611 = vmatprep.subr.mxu0 %v1876_v1  ;;  %v707_v11 = vmul.f32 %v1258_v0, %v2069_v49 }
  0x59   :  { %1646 = vmatprep.subr.mxu1 %v1876_v1  ;;  %1612 = vmatpush3.msra.mxu0 %v336_v15  ;;  %v584_v15 = vmul.f32 %v1225_v4, %v2065_v46 }
  0x5a   :  { %1647 = vmatpush3.msra.mxu1 %v458_v18  ;;  %1613 = vmatprep.subr.mxu0 %v1876_v1  ;;  %v706_v18 = vmul.f32 %v1257_v7, %v2069_v49 }
  0x5b   :  { %1648 = vmatprep.subr.mxu1 %v1876_v1  ;;  %1614 = vmatpush3.msra.mxu0 %v335_v20  ;;  %v583_v20 = vmul.f32 %v1222_v9, %v2065_v46  ;;  %v1294_v9 = vunpack.c.h.bf16 %v1378_v5 }
  0x5c   :  { %1649 = vmatpush3.msra.mxu1 %v457_v22  ;;  %1615 = vmatprep.subr.mxu0 %v1876_v1  ;;  %v705_v22 = vmul.f32 %v1254_v12, %v2069_v49 }
  0x5d   :  { %1650 = vmatprep.subr.mxu1 %v1876_v1  ;;  %1616 = vmatpush3.msra.mxu0 %v334_v26  ;;  %v582_v26 = vmul.f32 %v1221_v16, %v2065_v46  ;;  %v1293_v16 = vunpack.c.l.bf16 %v1378_v5 }
  0x5e   :  { %1651 = vmatpush3.msra.mxu1 %v456_v30  ;;  %1617 = vmatprep.subr.mxu0 %v1876_v1  ;;  %v704_v30 = vmul.f32 %v1253_v19, %v2069_v49 }
  0x5f   :  { %1652 = vmatprep.subr.mxu1 %v1876_v1  ;;  %1618 = vmatpush3.msra.mxu0 %v333_v31  ;;  %v581_v31 = vmul.f32 %v1218_v21, %v2065_v46  ;;  %v1290_v21 = vunpack.c.h.bf16 %v1377_v13 }
  0x60   :  { %1653 = vmatpush3.msra.mxu1 %v455_v33  ;;  %1619 = vmatprep.subr.mxu0 %v1876_v1  ;;  %v703_v33 = vmul.f32 %v1250_v23, %v2069_v49  ;;  %v1322_v23 = vunpack.c.h.bf16 %v1384_v17 }
  0x61   :  { %1654 = vmatprep.subr.mxu1 %v1876_v1  ;;  %1620 = vmatpush3.msra.mxu0 %v332_v35  ;;  %v1359_v35 = vld [vmem:[#allocation2 + $0x108] sm:$0xff]  }
  0x62   :  { %1655 = vmatpush3.msra.mxu1 %v454_v37  ;;  %1621 = vmatprep.subr.mxu0 %v1876_v1  ;;  %v1213_v37 = vunpack.c.l.bf16 %v1360_v24  ;;  %v1209_v48 = vunpack.c.l.bf16 %v1359_v35  ;;  %v1376_v24 = vld [vmem:[#allocation2 + $0x1a0] sm:$0xff]  }
  0x63   :  { %1656 = vmatprep.subr.mxu1 %v1876_v1  ;;  %1622 = vmatpush3.msra.mxu0 %v331_v40  ;;  %v1245_v40 = vunpack.c.l.bf16 %v1367_v29  ;;  %v1383_v29 = vld [vmem:[#allocation2 + $0x1e0] sm:$0xff]   ;;  %v1286_v32 = vunpack.c.h.bf16 %v1376_v24 }
  0x64   :  { %1657 = vmatpush3.msra.mxu1 %v453_v42  ;;  %1623 = vmatprep.subr.mxu0 %v1876_v1  ;;  %v1210_v42 = vunpack.c.h.bf16 %v1359_v35  ;;  %v578_v47 = vmul.f32 %v1213_v37, %v2065_v46  ;;  %v576_v55 = vmul.f32 %v1209_v48, %v2065_v46  ;;  %v1375_v35 = vld [vmem:[#allocation2 + $0x198] sm:$0xff]   ;;  %v1285_v37 = vunpack.c.l.bf16 %v1376_v24 }
  0x65   :  { %1658 = vmatprep.subr.mxu1 %v1876_v1  ;;  %1624 = vmatpush3.msra.mxu0 %v330_v43  ;;  %v701_v43 = vmul.f32 %v1246_v34, %v2069_v49  ;;  %v700_v51 = vmul.f32 %v1245_v40, %v2069_v49  ;;  %v1318_v34 = vunpack.c.h.bf16 %v1383_v29  ;;  %v1317_v40 = vunpack.c.l.bf16 %v1383_v29 }
  0x66   :  { %1625 = vmatprep.mubr.msk.f32.mxu0 %vm1877_vm0, %v1876_v1  ;;  %1659 = vmatpush3.msra.mxu1 %v452_v45  ;;  %v1204_v45 = vld [vmem:[#allocation2 + $0x100] sm:$0xff]   ;;  %v1281_v48 = vunpack.c.l.bf16 %v1375_v35 }
  0x67   :  { %1626 = vmatmul.mubr.f32.vlgmr.msra.gmra.mxu0 %v1990_v10  ;;  %1660 = vmatprep.mubr.msk.f32.mxu1 %vm1877_vm0, %v1876_v1  ;;  %v1206_v52 = vunpack.c.h.bf16 %v1204_v45 }
  0x68   :  { %1663 = vmatprep.subr.mxu0 %v1876_v1  ;;  %1698 = vmatprep.subr.mxu1 %v1876_v1 }
  0x69   :  { %1661 = vmatmul.mubr.f32.vlgmr.msra.gmra.mxu1 %v1990_v10  ;;  %1664 = vmatpush3.msra.mxu0 %v589_v28  ;;  %v577_v28 = vmul.f32 %v1210_v42, %v2065_v46  ;;  %v575_v60 = vmul.f32 %v1206_v52, %v2065_v46  ;;  %v1282_v42 = vunpack.c.h.bf16 %v1375_v35 }
  0x6a   :  { %1699 = vmatpush3.msra.mxu1 %v711_v53  ;;  %1665 = vmatprep.subr.mxu0 %v1876_v1  ;;  %v699_v53 = vmul.f32 %v1242_v44, %v2069_v49  ;;  %v1314_v44 = vunpack.c.h.bf16 %v1382_v38 }
  0x6b   :  { %1700 = vmatprep.subr.mxu1 %v1876_v1  ;;  %1666 = vmatpush3.msra.mxu0 %v588_v56  ;;  %v1205_v56 = vunpack.c.l.bf16 %v1204_v45  ;;  %v1374_v45 = vld [vmem:[#allocation2 + $0x190] sm:$0xff]  }
  0x6c   :  { %1701 = vmatpush3.msra.mxu1 %v710_v59  ;;  %1667 = vmatprep.subr.mxu0 %v1876_v1  ;;  %v1379_v59 = vld [vmem:[#allocation2 + $0x1b8] sm:$0xff]   ;;  %v1278_v52 = vunpack.c.h.bf16 %v1374_v45 }
  0x6d   :  { %1702 = vmatprep.subr.mxu1 %v1876_v1  ;;  %1668 = vmatpush3.msra.mxu0 %v587_v61  ;;  %v1386_v61 = vld [vmem:[#allocation2 + $0x1f8] sm:$0xff]   ;;  %v1298_v0 = vunpack.c.h.bf16 %v1379_v59  ;;  %v1297_v7 = vunpack.c.l.bf16 %v1379_v59 }
  0x6e   :  { %1703 = vmatpush3.msra.mxu1 %v709_v63  ;;  %1669 = vmatprep.subr.mxu0 %v1876_v1  ;;  %v574_v63 = vmul.f32 %v1205_v56, %v2065_v46  ;;  %v1330_v4 = vunpack.c.h.bf16 %v1386_v61  ;;  %v1329_v46 = vunpack.c.l.bf16 %v1386_v61 }
  0x6f   :  { %1704 = vmatprep.subr.mxu1 %v1876_v1  ;;  %1670 = vmatpush3.msra.mxu0 %v586_v3  ;;  %v2145_v3 = vstv %s2124_s6 }
  0x70   :  { %1705 = vmatpush3.msra.mxu1 %v708_v6  ;;  %1671 = vmatprep.subr.mxu0 %v1876_v1  ;;  %v2149_v6 = vstv %s2128_s7  ;;  %v833_v49 = vmul.f32 %v1298_v0, %v2145_v3  ;;  %v824_v56 = vmul.f32 %v1281_v48, %v2145_v3  ;;  %v823_v61 = vmul.f32 %v1278_v52, %v2145_v3 }
  0x71   :  { %1706 = vmatprep.subr.mxu1 %v1876_v1  ;;  %1672 = vmatpush3.msra.mxu0 %v585_v8  ;;  %v1385_v8 = vld [vmem:[#allocation2 + $0x1f0] sm:$0xff]   ;;  %v946_v59 = vmul.f32 %v1313_v25, %v2149_v6  ;;  %v1306_v0 = vunpack.c.h.bf16 %v1380_v58 }
  0x72   :  { %1707 = vmatpush3.msra.mxu1 %v707_v11  ;;  %1673 = vmatprep.subr.mxu0 %v1876_v1  ;;  %v955_v11 = vmul.f32 %v1330_v4, %v2149_v6  ;;  %v1326_v12 = vunpack.c.h.bf16 %v1385_v8  ;;  %v1325_v19 = vunpack.c.l.bf16 %v1385_v8 }
  0x73   :  { %1708 = vmatprep.subr.mxu1 %v1876_v1  ;;  %1674 = vmatpush3.msra.mxu0 %v584_v15  ;;  %v832_v15 = vmul.f32 %v1297_v7, %v2145_v3  ;;  %v1300_v7 = vld [vmem:[#allocation2 + $0x1c0] sm:$0xff]  }
  0x74   :  { %1709 = vmatpush3.msra.mxu1 %v706_v18  ;;  %1675 = vmatprep.subr.mxu0 %v1876_v1  ;;  %v954_v18 = vmul.f32 %v1329_v46, %v2149_v6  ;;  %v1305_v46 = vunpack.c.l.bf16 %v1380_v58  ;;  %v1301_v17 = vunpack.c.l.bf16 %v1300_v7 }
  0x75   :  { %1710 = vmatprep.subr.mxu1 %v1876_v1  ;;  %1676 = vmatpush3.msra.mxu0 %v583_v20  ;;  %v831_v20 = vmul.f32 %v1294_v9, %v2145_v3 }
  0x76   :  { %1711 = vmatpush3.msra.mxu1 %v705_v22  ;;  %1677 = vmatprep.subr.mxu0 %v1876_v1  ;;  %v953_v22 = vmul.f32 %v1326_v12, %v2149_v6  ;;  %v1302_v12 = vunpack.c.h.bf16 %v1300_v7 }
  0x77   :  { %1712 = vmatprep.subr.mxu1 %v1876_v1  ;;  %1678 = vmatpush3.msra.mxu0 %v582_v26  ;;  %v830_v26 = vmul.f32 %v1293_v16, %v2145_v3  ;;  %v942_v16 = vmul.f32 %v1305_v46, %v2149_v6 }
  0x78   :  { %1713 = vmatpush3.msra.mxu1 %v704_v30  ;;  %1679 = vmatprep.subr.mxu0 %v1876_v1  ;;  %v952_v30 = vmul.f32 %v1325_v19, %v2149_v6  ;;  %v941_v19 = vmul.f32 %v1302_v12, %v2149_v6 }
  0x79   :  { %1714 = vmatprep.subr.mxu1 %v1876_v1  ;;  %1680 = vmatpush3.msra.mxu0 %v581_v31  ;;  %v829_v31 = vmul.f32 %v1290_v21, %v2145_v3  ;;  %v940_v21 = vmul.f32 %v1301_v17, %v2149_v6 }
  0x7a   :  { %1715 = vmatpush3.msra.mxu1 %v703_v33  ;;  %1681 = vmatprep.subr.mxu0 %v1876_v1  ;;  %v951_v33 = vmul.f32 %v1322_v23, %v2149_v6 }
  0x7b   :  { %1716 = vmatprep.subr.mxu1 %v1876_v1  ;;  %1682 = vmatpush3.msra.mxu0 %v580_v36  ;;  %v828_v36 = vmul.f32 %v1289_v27, %v2145_v3 }
  0x7c   :  { %1717 = vmatpush3.msra.mxu1 %v702_v39  ;;  %1683 = vmatprep.subr.mxu0 %v1876_v1  ;;  %v950_v39 = vmul.f32 %v1321_v14, %v2149_v6 }
  0x7d   :  { %1718 = vmatprep.subr.mxu1 %v1876_v1  ;;  %1684 = vmatpush3.msra.mxu0 %v579_v41  ;;  %v827_v41 = vmul.f32 %v1286_v32, %v2145_v3 }
  0x7e   :  { %1719 = vmatpush3.msra.mxu1 %v701_v43  ;;  %1685 = vmatprep.subr.mxu0 %v1876_v1  ;;  %v949_v43 = vmul.f32 %v1318_v34, %v2149_v6 }
  0x7f   :  { %1720 = vmatprep.subr.mxu1 %v1876_v1  ;;  %1686 = vmatpush3.msra.mxu0 %v578_v47  ;;  %v826_v47 = vmul.f32 %v1285_v37, %v2145_v3 }
  0x80   :  { %1721 = vmatpush3.msra.mxu1 %v700_v51  ;;  %1687 = vmatprep.subr.mxu0 %v1876_v1  ;;  %v948_v51 = vmul.f32 %v1317_v40, %v2149_v6 }
  0x81   :  { %1722 = vmatprep.subr.mxu1 %v1876_v1  ;;  %1688 = vmatpush3.msra.mxu0 %v577_v28  ;;  %v825_v28 = vmul.f32 %v1282_v42, %v2145_v3 }
  0x82   :  { %1723 = vmatpush3.msra.mxu1 %v699_v53  ;;  %1689 = vmatprep.subr.mxu0 %v1876_v1  ;;  %v947_v53 = vmul.f32 %v1314_v44, %v2149_v6 }
  0x83   :  { %1724 = vmatprep.subr.mxu1 %v1876_v1  ;;  %1690 = vmatpush3.msra.mxu0 %v576_v55  ;;  %v1373_v55 = vld [vmem:[#allocation2 + $0x188] sm:$0xff]  }
  0x84   :  { %1725 = vmatpush3.msra.mxu1 %v698_v57  ;;  %1691 = vmatprep.subr.mxu0 %v1876_v1  ;;  %v1277_v57 = vunpack.c.l.bf16 %v1374_v45  ;;  %v1273_v5 = vunpack.c.l.bf16 %v1373_v55 }
  0x85   :  { %1726 = vmatprep.subr.mxu1 %v1876_v1  ;;  %1692 = vmatpush3.msra.mxu0 %v575_v60  ;;  %v1309_v60 = vunpack.c.l.bf16 %v1381_v50 }
  0x86   :  { %1727 = vmatpush3.msra.mxu1 %v697_v62  ;;  %1693 = vmatprep.subr.mxu0 %v1876_v1  ;;  %v1274_v62 = vunpack.c.h.bf16 %v1373_v55  ;;  %v822_v4 = vmul.f32 %v1277_v57, %v2145_v3  ;;  %v820_v13 = vmul.f32 %v1273_v5, %v2145_v3 }
  0x87   :  { %1728 = vmatprep.subr.mxu1 %v1876_v1  ;;  %1694 = vmatpush3.msra.mxu0 %v574_v63  ;;  %v945_v63 = vmul.f32 %v1310_v54, %v2149_v6  ;;  %v944_v8 = vmul.f32 %v1309_v60, %v2149_v6 }
  0x88   :  { %1695 = vmatprep.mubr.msk.f32.mxu0 %vm1877_vm0, %v1876_v1  ;;  %1729 = vmatpush3.msra.mxu1 %v696_v2  ;;  %v1268_v2 = vld [vmem:[#allocation2 + $0x180] sm:$0xff]  }
  0x89   :  { %1696 = vmatmul.mubr.f32.vlgmr.msra.gmra.mxu0 %v1990_v10  ;;  %1730 = vmatprep.mubr.msk.f32.mxu1 %vm1877_vm0, %v1876_v1  ;;  %v1270_v9 = vunpack.c.h.bf16 %v1268_v2 }
  0x8a   :  { %1733 = vmatprep.subr.mxu0 %v1876_v1  ;;  %1768 = vmatprep.subr.mxu1 %v1876_v1 }
  0x8b   :  { %1731 = vmatmul.mubr.f32.vlgmr.msra.gmra.mxu1 %v1990_v10  ;;  %1734 = vmatpush3.msra.mxu0 %v833_v49  ;;  %v821_v49 = vmul.f32 %v1274_v62, %v2145_v3 }
  0x8c   :  { %1769 = vmatpush3.msra.mxu1 %v955_v11  ;;  %1735 = vmatprep.subr.mxu0 %v1876_v1  ;;  %v943_v11 = vmul.f32 %v1306_v0, %v2149_v6 }
  0x8d   :  { %1770 = vmatprep.subr.mxu1 %v1876_v1  ;;  %1736 = vmatpush3.msra.mxu0 %v832_v15  ;;  %v1269_v15 = vunpack.c.l.bf16 %v1268_v2 }
  0x8e   :  { %1771 = vmatpush3.msra.mxu1 %v954_v18  ;;  %1737 = vmatprep.subr.mxu0 %v1876_v1  ;;  %v819_v18 = vmul.f32 %v1270_v9, %v2145_v3 }
  0x8f   :  { %1772 = vmatprep.subr.mxu1 %v1876_v1  ;;  %1738 = vmatpush3.msra.mxu0 %v831_v20  ;;  %v818_v20 = vmul.f32 %v1269_v15, %v2145_v3 }
  0x90   :  { %1773 = vmatpush3.msra.mxu1 %v953_v22  ;;  %1739 = vmatprep.subr.mxu0 %v1876_v1 }
  0x91   :  { %1774 = vmatprep.subr.mxu1 %v1876_v1  ;;  %1740 = vmatpush3.msra.mxu0 %v830_v26 }
  0x92   :  { %1775 = vmatpush3.msra.mxu1 %v952_v30  ;;  %1741 = vmatprep.subr.mxu0 %v1876_v1 }
  0x93   :  { %1776 = vmatprep.subr.mxu1 %v1876_v1  ;;  %1742 = vmatpush3.msra.mxu0 %v829_v31 }
  0x94   :  { %1777 = vmatpush3.msra.mxu1 %v951_v33  ;;  %1743 = vmatprep.subr.mxu0 %v1876_v1 }
  0x95   :  { %1778 = vmatprep.subr.mxu1 %v1876_v1  ;;  %1744 = vmatpush3.msra.mxu0 %v828_v36 }
  0x96   :  { %1779 = vmatpush3.msra.mxu1 %v950_v39  ;;  %1745 = vmatprep.subr.mxu0 %v1876_v1  ;;  %v1073_v39 = vld [vmem:[%s2238_s3] ss:$0 sm:$0xff] }
  0x97   :  { %1780 = vmatprep.subr.mxu1 %v1876_v1  ;;  %1746 = vmatpush3.msra.mxu0 %v827_v41 }
  0x98   :  { %1781 = vmatpush3.msra.mxu1 %v949_v43  ;;  %1747 = vmatprep.subr.mxu0 %v1876_v1 }
  0x99   :  { %1782 = vmatprep.subr.mxu1 %v1876_v1  ;;  %1748 = vmatpush3.msra.mxu0 %v826_v47 }
  0x9a   :  { %1783 = vmatpush3.msra.mxu1 %v948_v51  ;;  %1749 = vmatprep.subr.mxu0 %v1876_v1 }
  0x9b   :  { %1784 = vmatprep.subr.mxu1 %v1876_v1  ;;  %1750 = vmatpush3.msra.mxu0 %v825_v28 }
  0x9c   :  { %1785 = vmatpush3.msra.mxu1 %v947_v53  ;;  %1751 = vmatprep.subr.mxu0 %v1876_v1 }
  0x9d   :  { %1786 = vmatprep.subr.mxu1 %v1876_v1  ;;  %1752 = vmatpush3.msra.mxu0 %v824_v56 }
  0x9e   :  { %1787 = vmatpush3.msra.mxu1 %v946_v59  ;;  %1753 = vmatprep.subr.mxu0 %v1876_v1 }
  0x9f   :  { %1788 = vmatprep.subr.mxu1 %v1876_v1  ;;  %1754 = vmatpush3.msra.mxu0 %v823_v61 }
  0xa0   :  { %1789 = vmatpush3.msra.mxu1 %v945_v63  ;;  %1755 = vmatprep.subr.mxu0 %v1876_v1 }
  0xa1   :  { %1790 = vmatprep.subr.mxu1 %v1876_v1  ;;  %1756 = vmatpush3.msra.mxu0 %v822_v4 }
  0xa2   :  { %1791 = vmatpush3.msra.mxu1 %v944_v8  ;;  %1757 = vmatprep.subr.mxu0 %v1876_v1 }
  0xa3   :  { %1792 = vmatprep.subr.mxu1 %v1876_v1  ;;  %1758 = vmatpush3.msra.mxu0 %v821_v49 }
  0xa4   :  { %1793 = vmatpush3.msra.mxu1 %v943_v11  ;;  %1759 = vmatprep.subr.mxu0 %v1876_v1 }
  0xa5   :  { %1794 = vmatprep.subr.mxu1 %v1876_v1  ;;  %1760 = vmatpush3.msra.mxu0 %v820_v13 }
  0xa6   :  { %1795 = vmatpush3.msra.mxu1 %v942_v16  ;;  %1761 = vmatprep.subr.mxu0 %v1876_v1 }
  0xa7   :  { %1796 = vmatprep.subr.mxu1 %v1876_v1  ;;  %1762 = vmatpush3.msra.mxu0 %v819_v18 }
  0xa8   :  { %1797 = vmatpush3.msra.mxu1 %v941_v19  ;;  %1763 = vmatprep.subr.mxu0 %v1876_v1 }
  0xa9   :  { %1798 = vmatprep.subr.mxu1 %v1876_v1  ;;  %1764 = vmatpush3.msra.mxu0 %v818_v20 }
  0xaa   :  { %1765 = vmatprep.mubr.msk.f32.mxu0 %vm1877_vm0, %v1876_v1  ;;  %1799 = vmatpush3.msra.mxu1 %v940_v21 }
  0xab   :  { %1800 = vmatprep.mubr.msk.f32.mxu1 %vm1877_vm0, %v1876_v1  ;;  %1766 = vmatmul.mubr.f32.vlgmr.msra.gmra.mxu0 %v1990_v10 }
  0xac   :  { %1801 = vmatmul.mubr.f32.vlgmr.msra.gmra.mxu1 %v1990_v10 }
 0x105   :  { %v168_v3 = vpop.f32.mrf.mxu0 }
 0x107   :  { %v290_v6 = vpop.f32.mrf.mxu1  ;;  %v1557_v22 = vpop.f32.mrf.mxu0 }
 0x108   :  { %v294_v23 = vadd.f32 %v290_v6, %v168_v3 }
 0x109   :  { %v1592_v24 = vpop.f32.mrf.mxu1 }
 0x127   :  { %v412_v26 = vpop.f32.mrf.mxu0 }
 0x128   :  { %v416_v34 = vadd.f32 %v412_v26, %v294_v23 }
 0x129   :  { %v534_v27 = vpop.f32.mrf.mxu1  ;;  %v1627_v29 = vpop.f32.mrf.mxu0 }
 0x12a   :  { %v538_v35 = vadd.f32 %v534_v27, %v416_v34 }
 0x12b   :  { %v1662_v30 = vpop.f32.mrf.mxu1 }
 0x149   :  { %v656_v14 = vpop.f32.mrf.mxu0 }
 0x14a   :  { %v660_v1 = vadd.f32 %v656_v14, %v538_v35 }
 0x14b   :  { %v778_v31 = vpop.f32.mrf.mxu1  ;;  %v1697_v32 = vpop.f32.mrf.mxu0 }
 0x14c   :  { %v782_v36 = vadd.f32 %v778_v31, %v660_v1 }
 0x14d   :  { %v1732_v33 = vpop.f32.mrf.mxu1 }
 0x16b   :  { %v900_v37 = vpop.f32.mrf.mxu0 }
 0x16c   :  { %v904_v38 = vadd.f32 %v900_v37, %v782_v36  ;;  %v1022_v10 = vpop.f32.mrf.mxu1 }
 0x16d   :  { %v1767_v40 = vpop.f32.mrf.mxu0 }
 0x16e   :  { %v1026_v41 = vadd.f32 %v1022_v10, %v904_v38  ;;  %v1802_v42 = vpop.f32.mrf.mxu1 }
 0x170   :  { %v1042_v43 = vadd.f32 %v1073_v39, %v1026_v41 }
 0x172   :  { %v1074_v44 = vmul.f32 -1.442695, %v1042_v43 }
 0x174   :  { %1810 = vpow2.f32 %v1074_v44 }
 0x181   :  { %v1811_v45 = vpop.eup %1810 }
 0x182   :  { %v1046_v47 = vadd.f32 1.0, %v1811_v45 }
 0x184   :  { %1812 = vrcp.f32 %v1046_v47 }
 0x191   :  { %v1813_v48 = vpop.eup %1812 }
 0x192   :  { %1049 = vst [vmem:[#allocation7] sm:$0xff] %v1813_v48 }
 0x193   :  { %1857 = shalt.err (!%p1854_p0)
}
 0x194   :  { %1059 = dma.vmem_to_hbm [thread:$0]  %s1057_s11, 128, %s2239_s4, [#allocation4]  }
 0x195   :  { %1870 = dma.done.wait [#allocation4], 128  }
 0x196   :  { %1871 = vsyncadd [#allocation4], 4294967168 }
 0x197   :  { %1063 = vsyncpa [#allocation3], 1 }
 0x198   :  { %1064 = vsyncpa [#allocation4], 1 }
 0x199   :  { %1065 = vsyncpa [#allocation5], 1 }

</bundles_post_ra>
